<compile_context>
chip_gen: v7x
topology: tpu7x:2x2x1
jax: 0.10.0
libtpu: 0.0.40
codegen_flags: <defaults>
</compile_context>

<pallas_src>
import functools

import jax
import jax.numpy as jnp
from jax.experimental import pallas as pl
from jax.experimental.pallas import tpu as pltpu

LANE = 128
SUBLANE = 8
TARGET_TILE_ROWS = 2048   # (2048,128) f32 tile = 1 MiB; 2 inputs x 2 bufs = 4 MiB VMEM
CHUNK_ROWS = 64           # inner fold granularity: 8 f32 vregs per operand chunk


def _sublane_multiple(dtype) -> int:
    """Packed-sublane granularity for a dtype (8 for 32-bit, 16 bf16, 32 int8/fp8)."""
    return {4: 8, 2: 16, 1: 32}.get(jnp.dtype(dtype).itemsize, 8)


def _num_core_slices() -> int:
    """2 on v7x (two TensorCores/chip); 1 elsewhere (the split is overhead on 1-TC chips)."""
    try:
        kind = jax.devices()[0].device_kind.lower()
    except Exception:
        return 1
    return 2 if ("v7" in kind or "7x" in kind) else 1


def _fold_chunk(p, t):
    """(rows,128) chunk -> ((8,128) partial of p*t, (8,128) partial of p+t). Pure VPU."""
    p = p.astype(jnp.float32)
    t = t.astype(jnp.float32)
    part_inter = (p * t).reshape(-1, SUBLANE, LANE).sum(axis=0)
    part_sum = (p + t).reshape(-1, SUBLANE, LANE).sum(axis=0)
    return part_inter, part_sum


def _accum_tile(p_ref, t_ref, tile_rows):
    """Fold one (tile_rows,128) tile into two (8,128) partials with bounded live ranges."""
    chunk = min(CHUNK_ROWS, tile_rows)
    nfull = tile_rows // chunk
    rem = tile_rows - nfull * chunk       # static; multiple of 8 by construction

    def body(k, carry):
        acc_i, acc_s = carry
        r0 = pl.multiple_of(k * chunk, chunk)
        d_i, d_s = _fold_chunk(p_ref[pl.ds(r0, chunk), :],
                               t_ref[pl.ds(r0, chunk), :])
        return acc_i + d_i, acc_s + d_s

    zero = jnp.zeros((SUBLANE, LANE), jnp.float32)
    acc_i, acc_s = jax.lax.fori_loop(0, nfull, body, (zero, zero),
                                     unroll=min(8, nfull))
    if rem:
        d_i, d_s = _fold_chunk(p_ref[pl.ds(nfull * chunk, rem), :],
                               t_ref[pl.ds(nfull * chunk, rem), :])
        acc_i, acc_s = acc_i + d_i, acc_s + d_s
    return acc_i, acc_s


def _dice_partials_kernel(p_ref, t_ref, inter_ref, sum_ref, *,
                          tile_rows, steps_per_slice, nblocks, needs_skip):
    c = pl.program_id(0)   # core slice (parallel; 1 on v5e/v6e, 2 on v7x)
    i = pl.program_id(1)   # reduction step (arbitrary)

    @pl.when(i == 0)
    def _():
        inter_ref[...] = jnp.zeros_like(inter_ref)
        sum_ref[...] = jnp.zeros_like(sum_ref)

    def accumulate():
        acc_i, acc_s = _accum_tile(p_ref, t_ref, tile_rows)
        inter_ref[0] += acc_i
        sum_ref[0] += acc_s

    if needs_skip:
        # Only when nblocks doesn't split evenly across core slices: the last
        # logical block is a clamped duplicate -> scalar-gated skip (no per-vreg cost).
        block = c * steps_per_slice + i

        @pl.when(block < nblocks)
        def _():
            accumulate()
    else:
        accumulate()


def dice_loss(prediction, target, smooth=1.0):
    # `smooth` is accepted for signature parity but, like the PyTorch forward,
    # the constant 1 is what the formula uses.
    assert prediction.shape == target.shape

    p_flat = prediction.reshape(-1)
    t_flat = target.reshape(-1)
    n = p_flat.shape[0]

    gran = max(_sublane_multiple(prediction.dtype), _sublane_multiple(target.dtype))
    rows_total = n // LANE
    tile_rows = min(TARGET_TILE_ROWS, (rows_total // gran) * gran)

    intersection = jnp.float32(0.0)
    sum_pt = jnp.float32(0.0)   # sum(p) + sum(t)
    bulk_elems = 0

    if tile_rows > 0:
        nblocks = rows_total // tile_rows
        bulk_rows = nblocks * tile_rows
        bulk_elems = bulk_rows * LANE

        num_slices = min(_num_core_slices(), nblocks)
        steps = pl.cdiv(nblocks, num_slices)
        needs_skip = (num_slices * steps != nblocks)

        if bulk_elems == n:
            p_bulk = p_flat.reshape(bulk_rows, LANE)   # free (metadata only)
            t_bulk = t_flat.reshape(bulk_rows, LANE)
        else:
            # TODO(synk): for sizes not covered by whole tiles this prefix slice may
            # materialize a copy; a fully in-kernel ragged path would avoid it.
            p_bulk = p_flat[:bulk_elems].reshape(bulk_rows, LANE)
            t_bulk = t_flat[:bulk_elems].reshape(bulk_rows, LANE)

        def in_index_map(c, i):
            block = c * steps + i
            if needs_skip:
                block = jnp.minimum(block, nblocks - 1)   # kernel skips the duplicate
            return (block, 0)

        in_spec = pl.BlockSpec((tile_rows, LANE), in_index_map)
        out_spec = pl.BlockSpec((1, SUBLANE, LANE), lambda c, i: (c, 0, 0))

        kernel = functools.partial(
            _dice_partials_kernel,
            tile_rows=tile_rows,
            steps_per_slice=steps,
            nblocks=nblocks,
            needs_skip=needs_skip,
        )

        in_bytes = bulk_elems * (p_bulk.dtype.itemsize + t_bulk.dtype.itemsize)
        out_bytes = 2 * num_slices * SUBLANE * LANE * 4
        cost = pl.CostEstimate(flops=3 * bulk_elems, transcendentals=0,
                               bytes_accessed=in_bytes + out_bytes)

        inter_part, sum_part = pl.pallas_call(
            kernel,
            out_shape=(
                jax.ShapeDtypeStruct((num_slices, SUBLANE, LANE), jnp.float32),
                jax.ShapeDtypeStruct((num_slices, SUBLANE, LANE), jnp.float32),
            ),
            grid=(num_slices, steps),
            in_specs=[in_spec, in_spec],
            out_specs=(out_spec, out_spec),
            compiler_params=pltpu.CompilerParams(
                dimension_semantics=("parallel", "arbitrary")),
            cost_estimate=cost,
        )(p_bulk, t_bulk)

        # Tiny final reduce (<= 2*num_slices*1024 floats); XLA fuses it with the
        # scalar dice formula below, so no separate launch is saved by doing it in-kernel.
        intersection = jnp.sum(inter_part)
        sum_pt = jnp.sum(sum_part)

    if bulk_elems < n:
        # Ragged tail not covered by whole tiles (< tile_rows*128 + 128 elements).
        p_tail = p_flat[bulk_elems:].astype(jnp.float32)
        t_tail = t_flat[bulk_elems:].astype(jnp.float32)
        intersection = intersection + jnp.sum(p_tail * t_tail)
        sum_pt = sum_pt + jnp.sum(p_tail + t_tail)

    union = sum_pt + jnp.float32(1.0)           # sum(p) + sum(t) + 1
    dice = (2.0 * intersection + 1.0) / union
    return (1.0 - dice).astype(jnp.float32)


if __name__ == "__main__":
    key = jax.random.PRNGKey(0)
    kp, kt = jax.random.split(key)

    # NCHW inputs, small shapes: batch=2, channels=4, spatial=16x16
    prediction = jax.nn.sigmoid(
        jax.random.normal(kp, (2, 4, 16, 16), dtype=jnp.float32)
    )
    target = (
        jax.random.uniform(kt, (2, 4, 16, 16), dtype=jnp.float32) > 0.5
    ).astype(jnp.float32)

    loss = jax.jit(dice_loss)(prediction, target)
    jax.block_until_ready(loss)

    # Pure-JAX reference check (same math as the PyTorch forward).
    inter_ref = jnp.sum(prediction * target)
    union_ref = jnp.sum(prediction) + jnp.sum(target) + 1.0
    loss_ref = 1.0 - (2.0 * inter_ref + 1.0) / union_ref
    assert jnp.allclose(loss, loss_ref, rtol=1e-5, atol=1e-5), (loss, loss_ref)

    print("KERNEL_OK")
</pallas_src>

<mosaic_0001>
module attributes {stable_mosaic.version = 11 : i64} {
  func.func @_dice_partials_kernel(%arg0: i32, %arg1: i32, %arg2: memref<16x128xf32, #tpu.memory_space<vmem>>, %arg3: memref<16x128xf32, #tpu.memory_space<vmem>>, %arg4: memref<1x8x128xf32, #tpu.memory_space<vmem>>, %arg5: memref<1x8x128xf32, #tpu.memory_space<vmem>>) attributes {dimension_semantics = [#tpu.dimension_semantics<parallel>, #tpu.dimension_semantics<arbitrary>], iteration_bounds = array<i64: 1, 1>, scalar_prefetch = 0 : i64, scratch_operands = 0 : i64, tpu.core_type = #tpu.core_type<tc>, window_params = [{transform_indices = @transform_0, window_bounds = array<i64: 16, 128>}, {transform_indices = @transform_1, window_bounds = array<i64: 16, 128>}, {transform_indices = @transform_2, window_bounds = array<i64: 1, 8, 128>}, {transform_indices = @transform_3, window_bounds = array<i64: 1, 8, 128>}]} {
    %c0_i32 = arith.constant 0 : i32
    %0 = arith.cmpi eq, %arg1, %c0_i32 : i32
    %1 = arith.extui %0 : i1 to i32
    %c0_i32_0 = arith.constant 0 : i32
    %2 = arith.cmpi ne, %1, %c0_i32_0 : i32
    scf.if %2 {
      %cst_17 = arith.constant 0.000000e+00 : f32
      %30 = vector.broadcast %cst_17 : f32 to vector<1x8x128xf32>
      %c0_18 = arith.constant 0 : index
      %c0_19 = arith.constant 0 : index
      %c0_20 = arith.constant 0 : index
      %31 = vector.load %arg4[%c0_18, %c0_19, %c0_20] : memref<1x8x128xf32, #tpu.memory_space<vmem>>, vector<1x8x128xf32>
      tpu.vector_store %arg4[%c0_18, %c0_19, %c0_20], %30 {strides = array<i32>} : memref<1x8x128xf32, #tpu.memory_space<vmem>>, vector<1x8x128xf32>,
      %cst_21 = arith.constant 0.000000e+00 : f32
      %32 = vector.broadcast %cst_21 : f32 to vector<1x8x128xf32>
      %c0_22 = arith.constant 0 : index
      %c0_23 = arith.constant 0 : index
      %c0_24 = arith.constant 0 : index
      %33 = vector.load %arg5[%c0_22, %c0_23, %c0_24] : memref<1x8x128xf32, #tpu.memory_space<vmem>>, vector<1x8x128xf32>
      tpu.vector_store %arg5[%c0_22, %c0_23, %c0_24], %32 {strides = array<i32>} : memref<1x8x128xf32, #tpu.memory_space<vmem>>, vector<1x8x128xf32>,
    } else {
    }
    %cst = arith.constant 0.000000e+00 : f32
    %3 = vector.broadcast %cst : f32 to vector<8x128xf32>
    %c0_i32_1 = arith.constant 0 : i32
    %c16_i32 = arith.constant 16 : i32
    %4 = arith.muli %c0_i32_1, %c16_i32 : i32
    %5 = tpu.assume_multiple %4, 16 : i32
    %6 = arith.index_cast %5 : i32 to index
    %c0 = arith.constant 0 : index
    %7 = vector.load %arg2[%6, %c0] : memref<16x128xf32, #tpu.memory_space<vmem>>, vector<16x128xf32>
    %8 = arith.index_cast %5 : i32 to index
    %c0_2 = arith.constant 0 : index
    %9 = vector.load %arg3[%8, %c0_2] : memref<16x128xf32, #tpu.memory_space<vmem>>, vector<16x128xf32>
    %10 = arith.mulf %7, %9 : vector<16x128xf32>
    %11 = vector.shape_cast %10 : vector<16x128xf32> to vector<2x8x128xf32>
    %cst_3 = arith.constant dense<0.000000e+00> : vector<8x128xf32>
    %12 = vector.multi_reduction <add>, %11, %cst_3 [0] : vector<2x8x128xf32> to vector<8x128xf32>
    %13 = arith.addf %7, %9 : vector<16x128xf32>
    %14 = vector.shape_cast %13 : vector<16x128xf32> to vector<2x8x128xf32>
    %cst_4 = arith.constant dense<0.000000e+00> : vector<8x128xf32>
    %15 = vector.multi_reduction <add>, %14, %cst_4 [0] : vector<2x8x128xf32> to vector<8x128xf32>
    %16 = arith.addf %3, %12 : vector<8x128xf32>
    %17 = arith.addf %3, %15 : vector<8x128xf32>
    %c1_i32 = arith.constant 1 : i32
    %c0_5 = arith.constant 0 : index
    %c0_6 = arith.constant 0 : index
    %c0_7 = arith.constant 0 : index
    %18 = vector.load %arg4[%c0_5, %c0_6, %c0_7] : memref<1x8x128xf32, #tpu.memory_space<vmem>>, vector<1x8x128xf32>
    %19 = vector.shape_cast %18 : vector<1x8x128xf32> to vector<8x128xf32>
    %20 = arith.addf %19, %16 : vector<8x128xf32>
    %c0_8 = arith.constant 0 : index
    %c0_9 = arith.constant 0 : index
    %c0_10 = arith.constant 0 : index
    %21 = vector.load %arg4[%c0_8, %c0_9, %c0_10] : memref<1x8x128xf32, #tpu.memory_space<vmem>>, vector<1x8x128xf32>
    %22 = vector.shape_cast %21 : vector<1x8x128xf32> to vector<8x128xf32>
    %23 = vector.shape_cast %20 : vector<8x128xf32> to vector<1x8x128xf32>
    tpu.vector_store %arg4[%c0_8, %c0_9, %c0_10], %23 {strides = array<i32>} : memref<1x8x128xf32, #tpu.memory_space<vmem>>, vector<1x8x128xf32>,
    %c0_11 = arith.constant 0 : index
    %c0_12 = arith.constant 0 : index
    %c0_13 = arith.constant 0 : index
    %24 = vector.load %arg5[%c0_11, %c0_12, %c0_13] : memref<1x8x128xf32, #tpu.memory_space<vmem>>, vector<1x8x128xf32>
    %25 = vector.shape_cast %24 : vector<1x8x128xf32> to vector<8x128xf32>
    %26 = arith.addf %25, %17 : vector<8x128xf32>
    %c0_14 = arith.constant 0 : index
    %c0_15 = arith.constant 0 : index
    %c0_16 = arith.constant 0 : index
    %27 = vector.load %arg5[%c0_14, %c0_15, %c0_16] : memref<1x8x128xf32, #tpu.memory_space<vmem>>, vector<1x8x128xf32>
    %28 = vector.shape_cast %27 : vector<1x8x128xf32> to vector<8x128xf32>
    %29 = vector.shape_cast %26 : vector<8x128xf32> to vector<1x8x128xf32>
    tpu.vector_store %arg5[%c0_14, %c0_15, %c0_16], %29 {strides = array<i32>} : memref<1x8x128xf32, #tpu.memory_space<vmem>>, vector<1x8x128xf32>,
    return
  }
  func.func @transform_0(%arg0: i32, %arg1: i32) -> (i32, i32) {
    %c1_i32 = arith.constant 1 : i32
    %0 = arith.muli %arg0, %c1_i32 : i32
    %1 = arith.addi %0, %arg1 : i32
    %c0_i32 = arith.constant 0 : i32
    %c0_i32_0 = arith.constant 0 : i32
    return %1, %c0_i32 : i32, i32
  }
  func.func @transform_1(%arg0: i32, %arg1: i32) -> (i32, i32) {
    %c1_i32 = arith.constant 1 : i32
    %0 = arith.muli %arg0, %c1_i32 : i32
    %1 = arith.addi %0, %arg1 : i32
    %c0_i32 = arith.constant 0 : i32
    %c0_i32_0 = arith.constant 0 : i32
    return %1, %c0_i32 : i32, i32
  }
  func.func @transform_2(%arg0: i32, %arg1: i32) -> (i32, i32, i32) {
    %c0_i32 = arith.constant 0 : i32
    %c0_i32_0 = arith.constant 0 : i32
    %c0_i32_1 = arith.constant 0 : i32
    return %arg0, %c0_i32, %c0_i32_0 : i32, i32, i32
  }
  func.func @transform_3(%arg0: i32, %arg1: i32) -> (i32, i32, i32) {
    %c0_i32 = arith.constant 0 : i32
    %c0_i32_0 = arith.constant 0 : i32
    %c0_i32_1 = arith.constant 0 : i32
    return %arg0, %c0_i32, %c0_i32_0 : i32, i32, i32
  }
}

</mosaic_0001>

<bundles_post_ra>
// kernel: dice_loss.1
= control target key start
LH: loop header
LB: loop body
LE: loop exit
PB: predicated region body
PF: predicated region fallthrough
CT: control target
= control target key end

     0   :  { %s140_s0 = inlined_call_operand.vmem [shape: f32[16,128], index: 0, kind: input, shape index: {}]   ;;  %s141_s1 = inlined_call_operand.vmem [shape: f32[16,128], index: 1, kind: input, shape index: {}]   ;;  %s142_s2 = inlined_call_operand.vmem [shape: f32[1,8,128], index: 2, kind: output, shape index: {0}]   ;;  %s143_s3 = inlined_call_operand.vmem [shape: f32[1,8,128], index: 3, kind: output, shape index: {1}]  }
   0x1   :  { %v63_v0 = vld [vmem:[%s140_s0] sm:$0xff]  ;;  %v64_v1 = vld [vmem:[%s140_s0 + $0x8] sm:$0xff] }
   0x2   :  { %v65_v2 = vld [vmem:[%s141_s1] sm:$0xff]  ;;  %v66_v3 = vld [vmem:[%s141_s1 + $0x8] sm:$0xff] }
   0x3   :  { %v67_v4 = vmul.f32 %v65_v2, %v63_v0  ;;  %v70_v5 = vadd.f32 %v65_v2, %v63_v0  ;;  %v68_v6 = vmul.f32 %v66_v3, %v64_v1  ;;  %v71_v7 = vadd.f32 %v66_v3, %v64_v1 }
   0x5   :  { %v69_v8 = vadd.f32 %v68_v6, %v67_v4  ;;  %v72_v9 = vadd.f32 %v71_v7, %v70_v5 }
   0x7   :  { %77 = vst [vmem:[%s142_s2] sm:$0xff] %v69_v8  ;;  %80 = vst [vmem:[%s143_s3] sm:$0xff] %v72_v9 }

</bundles_post_ra>
